<compile_context>
chip_gen: v6e
topology: v6e:2x2x1
jax: 0.10.0
libtpu: 0.0.40
codegen_flags: <defaults>
</compile_context>

<pallas_src>
import jax
import jax.numpy as jnp
from jax.experimental import pallas as pl
from jax.experimental.pallas import tpu as pltpu


def _round_up(v, m):
    return ((v + m - 1) // m) * m


def _round_down(v, m):
    return (v // m) * m


def _linear_kernel(x_ref, wt_ref, o_ref):
    # One MXU matmul per (TM, in_size) x-tile against the VMEM-resident weight slab.
    # f32 accumulation regardless of the (bf16) streaming dtype.
    o_ref[...] = jnp.dot(
        x_ref[...], wt_ref[...], preferred_element_type=jnp.float32
    ).astype(o_ref.dtype)


def prepare_weight(weight, compute_dtype=jnp.bfloat16):
    """One-time setup: transpose the PyTorch-convention weight [n_labels, in_size]
    into a lane-padded [in_size, n_pad] slab (n_pad = round_up(n_labels, 128)) in
    the streaming compute dtype.  Padded columns are zero, so they contribute
    exact zeros to the padded logits and can be ignored by the consumer."""
    n_labels, in_size = weight.shape
    n_pad = _round_up(n_labels, 128)
    wt = jnp.zeros((in_size, n_pad), dtype=compute_dtype)
    wt = wt.at[:, :n_labels].set(weight.T.astype(compute_dtype))
    return wt


def _device_profile():
    """Return (is_v7x, vmem_budget_bytes, vmem_limit_bytes) for the attached TPU."""
    kind = ""
    try:
        kind = jax.devices()[0].device_kind.lower()
    except Exception:
        pass
    is_v7 = "v7" in kind
    big_vmem = (not is_v7) and any(t in kind for t in ("v4", "v5", "v6"))
    if is_v7:
        # 64 MiB physical / 32 MiB scoped VMEM: stay conservative.
        return True, 24 * 1024 * 1024, 32 * 1024 * 1024
    if big_vmem:
        # 128 MiB physical VMEM (v4/v5e/v6e): raise the budget so tm stays >= 512
        # even for large in_size (measured: tile 512 ~ 85% of HBM roofline).
        return False, 80 * 1024 * 1024, 96 * 1024 * 1024
    # Unknown part: conservative defaults that compile everywhere.
    return False, 24 * 1024 * 1024, 32 * 1024 * 1024


def _pick_tm(in_size, n_pad, in_bytes, out_bytes, *, cap, vmem_budget):
    """Largest batch-tile (multiple of 8, <= cap) whose working set fits the budget.
    Accounting: the pipeline double-buffers EVERY input spec, including the
    constant-index weight slab (2 * w_bytes), plus 2x x tiles and 2x output tiles."""
    w_bytes = 2 * in_size * n_pad * in_bytes
    tm = max(8, _round_down(cap, 8))
    while True:
        need = w_bytes + 2 * tm * in_size * in_bytes + 2 * tm * n_pad * out_bytes
        if need <= vmem_budget or tm <= 8:
            break
        tm = max(8, _round_down(tm // 2, 8))
    return tm


def classifier_module_1l_padded(x, wt_padded, *, block_m=None, out_dtype=jnp.float32):
    """Lane-padded logits y_pad = x @ W.T, shape [batch, n_pad] (padded columns are
    exact zeros).  Consumers (argmax / softmax / loss) should read this directly to
    avoid an extra HBM round-trip for narrowing.

    x         : [batch, in_size]  (pass it already in wt_padded.dtype, e.g. bf16,
                 to get the full bandwidth win; a fallback cast is applied here)
    wt_padded : [in_size, n_pad]  from prepare_weight()
    """
    batch, in_size = x.shape
    k_in, n_pad = wt_padded.shape
    assert k_in == in_size, "weight slab in_size mismatch"

    compute_dtype = wt_padded.dtype
    if x.dtype != compute_dtype:
        # Fallback only: prefer feeding x already in the compute dtype upstream,
        # otherwise this cast costs an extra HBM pass over x.
        x = x.astype(compute_dtype)

    is_v7, vmem_budget, vmem_limit = _device_profile()
    in_bytes = jnp.dtype(compute_dtype).itemsize
    out_bytes = jnp.dtype(out_dtype).itemsize

    cap = block_m if block_m is not None else 1024
    tm = _pick_tm(in_size, n_pad, in_bytes, out_bytes, cap=cap, vmem_budget=vmem_budget)
    tm = min(tm, _round_up(batch, 8))           # don't over-tile tiny batches

    num_m = pl.cdiv(batch, tm)                  # ragged last block handled by Pallas (no jnp.pad)
    # On v7x, actually shard the mem-bound M stream across the 2 TensorCores.
    m_sem = pltpu.CORE_PARALLEL if (is_v7 and num_m >= 2) else "parallel"

    out = pl.pallas_call(
        _linear_kernel,
        out_shape=jax.ShapeDtypeStruct((batch, n_pad), out_dtype),
        grid=(num_m,),
        in_specs=[
            # x streams over the batch axis (double-buffered by the pipeline).
            # TODO(synk): on v7x, consider pipeline_mode=pl.Buffered(3) here if
            # profiles show exposed DMA gaps between grid steps.
            pl.BlockSpec((tm, in_size), lambda i: (i, 0)),
            # Weight slab is constant across the grid -> stays resident in VMEM.
            pl.BlockSpec((in_size, n_pad), lambda i: (0, 0)),
        ],
        out_specs=pl.BlockSpec((tm, n_pad), lambda i: (i, 0)),
        compiler_params=pltpu.CompilerParams(
            dimension_semantics=(m_sem,),
            vmem_limit_bytes=vmem_limit,
        ),
    )(x, wt_padded)
    return out


def classifier_module_1l(x, wt_padded, n_labels, *, block_m=None, out_dtype=jnp.float32):
    """y = x @ W.T with the exact [batch, n_labels] shape of the PyTorch module.
    Prefer classifier_module_1l_padded when the consumer can read padded logits:
    the lane-dim slice below is a separate XLA copy outside the kernel (rows are
    exact, so only the lane dim is narrowed)."""
    out = classifier_module_1l_padded(x, wt_padded, block_m=block_m, out_dtype=out_dtype)
    return out[:, :n_labels]


if __name__ == "__main__":
    key = jax.random.PRNGKey(0)

    # --- Case 1: tiny shapes consistent with the module (f32 path, tight check).
    batch, in_size, n_labels = 4, 32, 8
    kx, kw, key = jax.random.split(key, 3)
    x = jax.random.normal(kx, (batch, in_size), dtype=jnp.float32)
    # Deterministic init mimicking torch.nn.Linear's uniform(-1/sqrt(in), 1/sqrt(in)).
    bound = 1.0 / (in_size ** 0.5)
    weight = jax.random.uniform(
        kw, (n_labels, in_size), dtype=jnp.float32, minval=-bound, maxval=bound
    )
    # TODO(synk): the custom `Linear(..., bh=False)` wrapper is not shown; assumed
    # bias-free plain linear (bh=False -> no bias).
    wt_f32 = prepare_weight(weight, compute_dtype=jnp.float32)  # one-time setup
    y = classifier_module_1l(x, wt_f32, n_labels)
    jax.block_until_ready(y)
    y_ref = x @ weight.T
    assert y.shape == (batch, n_labels)
    assert jnp.allclose(y, y_ref, atol=1e-5, rtol=1e-5)

    # --- Case 2: larger ragged-batch run on the recommended bf16 streaming path
    # (multiple M tiles, batch not a multiple of tm, output kept lane-padded).
    batch2, in_size2, n_labels2 = 1000, 256, 10
    kx2, kw2, key = jax.random.split(key, 3)
    x2 = jax.random.normal(kx2, (batch2, in_size2), dtype=jnp.float32)
    bound2 = 1.0 / (in_size2 ** 0.5)
    weight2 = jax.random.uniform(
        kw2, (n_labels2, in_size2), dtype=jnp.float32, minval=-bound2, maxval=bound2
    )
    wt_bf16 = prepare_weight(weight2, compute_dtype=jnp.bfloat16)
    x2_bf16 = x2.astype(jnp.bfloat16)   # feed bf16: halves the dominant x stream

    y2_pad = classifier_module_1l_padded(x2_bf16, wt_bf16, block_m=256)  # grid=(4,), last block ragged
    jax.block_until_ready(y2_pad)
    assert y2_pad.shape == (batch2, 128)
    # Padded lane columns are exact zeros -> consumer can read the slab directly.
    assert jnp.all(y2_pad[:, n_labels2:] == 0)

    y2 = y2_pad[:, :n_labels2]
    y2_ref = x2_bf16.astype(jnp.float32) @ weight2.T.astype(jnp.bfloat16).astype(jnp.float32)
    assert jnp.allclose(y2, y2_ref, atol=2e-2, rtol=2e-2)

    print("KERNEL_OK")
</pallas_src>

<mosaic_0001>
module attributes {stable_mosaic.version = 11 : i64} {
  func.func @_linear_kernel(%arg0: i32, %arg1: memref<8x32xf32, #tpu.memory_space<vmem>>, %arg2: memref<32x128xf32, #tpu.memory_space<vmem>>, %arg3: memref<8x128xf32, #tpu.memory_space<vmem>>) attributes {dimension_semantics = [#tpu.dimension_semantics<parallel>], iteration_bounds = array<i64: 1>, scalar_prefetch = 0 : i64, scratch_operands = 0 : i64, tpu.core_type = #tpu.core_type<tc>, window_params = [{transform_indices = @transform_0, window_bounds = array<i64: 8, 32>}, {pipeline_mode = #tpu.pipeline_mode<synchronous>, transform_indices = @transform_1, window_bounds = array<i64: 32, 128>}, {transform_indices = @transform_2, window_bounds = array<i64: 8, 128>}]} {
    %c0 = arith.constant 0 : index
    %c0_0 = arith.constant 0 : index
    %0 = vector.load %arg1[%c0, %c0_0] : memref<8x32xf32, #tpu.memory_space<vmem>>, vector<8x32xf32>
    %c0_1 = arith.constant 0 : index
    %c0_2 = arith.constant 0 : index
    %1 = vector.load %arg2[%c0_1, %c0_2] : memref<32x128xf32, #tpu.memory_space<vmem>>, vector<32x128xf32>
    %cst = arith.constant dense<0.000000e+00> : vector<8x128xf32>
    %2 = tpu.matmul %0, %1, %cst {dimension_numbers = #tpu.dot_dimension_numbers<[1], [0], [0], [1], [0, 0, 1, 1], [], []>} : vector<8x32xf32>, vector<32x128xf32>, vector<8x128xf32> -> vector<8x128xf32>
    %c0_3 = arith.constant 0 : index
    %c0_4 = arith.constant 0 : index
    %3 = vector.load %arg3[%c0_3, %c0_4] : memref<8x128xf32, #tpu.memory_space<vmem>>, vector<8x128xf32>
    tpu.vector_store %arg3[%c0_3, %c0_4], %2 {strides = array<i32>} : memref<8x128xf32, #tpu.memory_space<vmem>>, vector<8x128xf32>,
    return
  }
  func.func @transform_0(%arg0: i32) -> (i32, i32) {
    %c0_i32 = arith.constant 0 : i32
    %c0_i32_0 = arith.constant 0 : i32
    return %arg0, %c0_i32 : i32, i32
  }
  func.func @transform_1(%arg0: i32) -> (i32, i32) {
    %c0_i32 = arith.constant 0 : i32
    %c0_i32_0 = arith.constant 0 : i32
    %c0_i32_1 = arith.constant 0 : i32
    return %c0_i32, %c0_i32_0 : i32, i32
  }
  func.func @transform_2(%arg0: i32) -> (i32, i32) {
    %c0_i32 = arith.constant 0 : i32
    %c0_i32_0 = arith.constant 0 : i32
    return %arg0, %c0_i32 : i32, i32
  }
}

</mosaic_0001>

<bundles_post_ra>
// kernel: tpu_custom_call.1
= control target key start
LH: loop header
LB: loop body
LE: loop exit
PB: predicated region body
PF: predicated region fallthrough
CT: control target
= control target key end

     0   :  { %7 = vsyncpa [#allocation3], 0  ;;  %s269_s0 = inlined_call_operand.hbm [shape: f32[4,32], index: 0, kind: input, shape index: {}]   ;;  %s270_s1 = inlined_call_operand.hbm [shape: f32[32,128], index: 1, kind: input, shape index: {}]   ;;  %s271_s2 = inlined_call_operand.hbm [shape: f32[4,128], index: 2, kind: output, shape index: {}]  }
   0x1   :  { %8 = vsyncpa [#allocation6], 0 }
   0x2   :  { %9 = vsyncpa [#allocation4], 0 }
   0x3   :  { %14 = vsyncadd [#allocation3], 64  ;;  %s230_s9 = smov [#allocation2]  }
   0x4   :  { %s15_s10 = sshll.u32 %s230_s9, 4  ;;  %s16_s10 = int_to_ptr.vmem [resolvable:$true] %s15_s10 }
   0x5   :  { %s172_s11 = scalar_lea.vmem %s16_s10, 64  ;;  %s176_s12 = scalar_lea.vmem %s16_s10, 128 }
   0x6   :  { %p173_p0 = scmp.ne.s32.totalorder %s16_s10, %s172_s11  ;;  %p177_p1 = scmp.lt.s32.totalorder %s16_s10, %s16_s10 }
   0x7   :  { %p178_p2 = scmp.lt.s32.totalorder %s176_s12, %s172_s11 }
   0x9   :  { %p179_p3 = por %p178_p2, %p177_p1 }
   0xb   :  { %p180_p4 = pnand %p179_p3, %p173_p0 }
   0xd   :  { %183 = shalt.err (!%p180_p4)
}
   0xe   :  { %s231_s13 = smov 64   ;;  %s232_s14 = smov 4  }
   0xf   :  { %21 = dma.hbm_to_vmem [thread:$0]  %s269_s0, 64, %s16_s10, [#allocation3], %s231_s13, %s231_s13, %s232_s14  }
  0x10   :  { %s233_s17 = smov [#allocation5]  }
  0x11   :  { %s27_s18 = sshll.u32 %s233_s17, 4  ;;  %s28_s18 = int_to_ptr.vmem [resolvable:$true] %s27_s18 }
  0x12   :  { %s192_s19 = scalar_lea.vmem %s28_s18, 512  ;;  %p197_p6 = scmp.lt.s32.totalorder %s28_s18, %s28_s18 }
  0x13   :  { %p193_p5 = scmp.ne.s32.totalorder %s28_s18, %s192_s19  ;;  %p198_p7 = scmp.lt.s32.totalorder %s192_s19, %s192_s19 }
  0x15   :  { %p199_p8 = por %p198_p7, %p197_p6 }
  0x17   :  { %p200_p9 = pnand %p199_p8, %p193_p5 }
  0x19   :  { %203 = shalt.err (!%p200_p9)
}
  0x1a   :  { %s234_s20 = smov 128   ;;  %s235_s21 = smov 8  }
  0x1b   :  { %33 = dma.hbm_to_vmem [thread:$0]  %s270_s1, 512, %s28_s18, [#allocation6], %s234_s20, %s234_s20, %s235_s21  }
  0x1c   :  { %224 = dma.done.wait [#allocation3], 128  }
  0x1d   :  { %225 = vsyncadd [#allocation3], 4294967168 }
  0x1e   :  { %226 = dma.done.wait [#allocation6], 512  }
  0x1f   :  { %227 = vsyncadd [#allocation6], 4294966784  ;;  %v236_v0 = vmov 0.0   ;;  %vm237_vm0 = vmmov 0   ;;  %v44_v1 = vld [vmem:[#allocation5 + $0x18] sm:$0xff]  ;;  %v43_v2 = vld [vmem:[#allocation5 + $0x10] sm:$0xff] }
  0x20   :  { %144 = vmatprep.subr.mxu0 %v236_v0  ;;  %152 = vmatprep.mubr.msk.f32.mxu0 %vm237_vm0, %v236_v0  ;;  %v42_v3 = vld [vmem:[#allocation5 + $0x8] sm:$0xff]  ;;  %v41_v4 = vld [vmem:[#allocation5] sm:$0xff]  ;;  %v40_v5 = vld [vmem:[#allocation2] sm:$0xff]  ;;  %vm45_vm1 = vcmask 261120  }
  0x21   :  { %145 = vmatpush3.msra.mxu0 %v44_v1 }
  0x22   :  { %146 = vmatprep.subr.mxu0 %v236_v0 }
  0x23   :  { %147 = vmatpush3.msra.mxu0 %v43_v2 }
  0x24   :  { %148 = vmatprep.subr.mxu0 %v236_v0 }
  0x25   :  { %149 = vmatpush3.msra.mxu0 %v42_v3 }
  0x26   :  { %150 = vmatprep.subr.mxu0 %v236_v0 }
  0x27   :  { %151 = vmatpush3.msra.mxu0 %v41_v4 }
  0x28   :  { %153 = vmatmul.mubr.msk.f32.vlgmr.msra.gmra.mxu0 %vm45_vm1, %v40_v5 }
  0xe8   :  { %v115_v6 = vpop.f32.mrf.mxu0 }
  0xe9   :  { %119 = vst [vmem:[#allocation7] sm:$0xff] %v115_v6 }
  0xea   :  { %v154_v7 = vpop.f32.mrf.mxu0 }
  0xeb   :  { %124 = vsyncadd [#allocation4], 64  ;;  %s238_s0 = smov [#allocation7]  }
  0xec   :  { %s125_s1 = sshll.u32 %s238_s0, 4  ;;  %s126_s1 = int_to_ptr.vmem [resolvable:$true] %s125_s1 }
  0xed   :  { %s204_s24 = scalar_lea.vmem %s126_s1, 64  ;;  %s208_s25 = scalar_lea.vmem %s126_s1, 128 }
  0xee   :  { %p205_p10 = scmp.ne.s32.totalorder %s126_s1, %s204_s24  ;;  %p209_p11 = scmp.lt.s32.totalorder %s126_s1, %s126_s1 }
  0xef   :  { %p210_p12 = scmp.lt.s32.totalorder %s208_s25, %s204_s24 }
  0xf1   :  { %p211_p13 = por %p210_p12, %p209_p11 }
  0xf3   :  { %p212_p0 = pnand %p211_p13, %p205_p10 }
  0xf5   :  { %215 = shalt.err (!%p212_p0)
}
  0xf6   :  { %131 = dma.vmem_to_hbm [thread:$0]  %s126_s1, 64, %s271_s2, [#allocation4], %s231_s13, %s231_s13, %s232_s14  }
  0xf7   :  { %228 = dma.done.wait [#allocation4], 128  }
  0xf8   :  { %229 = vsyncadd [#allocation4], 4294967168 }
  0xf9   :  { %135 = vsyncpa [#allocation3], 1 }
  0xfa   :  { %136 = vsyncpa [#allocation6], 1 }
  0xfb   :  { %137 = vsyncpa [#allocation4], 1 }

</bundles_post_ra>
